<compile_context>
chip_gen: v7x
topology: tpu7x:2x2x1
jax: 0.10.0
libtpu: 0.0.40
codegen_flags: <defaults>
</compile_context>

<pallas_src>
import jax
import jax.numpy as jnp
from jax import lax
from jax.experimental import pallas as pl
from jax.experimental.pallas import tpu as pltpu


def _pick_block_batch(B):
    """Largest divisor of B that keeps at least 2 grid steps (v7x has 2 TCs)."""
    if B <= 2:
        return 1
    target = (B + 1) // 2
    for nb in range(target, 0, -1):
        if B % nb == 0:
            return nb
    return 1


def _make_kernel(nb, cin, cout, L, shifts):
    n_taps = len(shifts)

    def kernel(x1_ref, x2_ref, wa1_ref, wa2_ref, ba_ref, wmask_ref, bb_ref,
               wc1_ref, wc2_ref, bc_ref, o_ref):
        wa1 = wa1_ref[...]          # (3, cin)   first-1x1 weights applied to x1
        wa2 = wa2_ref[...]          # (3, cin)   first-1x1 weights applied to x2
        ba = ba_ref[...]            # (3, 1)
        bb = bb_ref[...]            # (3, 1)
        wc1 = wc1_ref[...]          # (cout, cin)
        wc2 = wc2_ref[...]          # (cout, cin)
        bc = bc_ref[...]            # (cout, 1)

        for n in range(nb):         # static unroll over the per-step batch tile
            x1 = x1_ref[n]          # (cin, L)
            x2 = x2_ref[n]          # (cin, L)

            # Three fused basicBlock first 1x1 convs (+ bias, ReLU):
            #   head 0 sees x1, head 1 sees x2, head 2 sees x1 + x2
            # (w3a duplicated into both wa1 and wa2 rows).
            z = jnp.maximum(
                jnp.dot(wa1, x1, preferred_element_type=jnp.float32)
                + jnp.dot(wa2, x2, preferred_element_type=jnp.float32)
                + ba, 0.0)                                          # (3, L)

            # 3x3 conv (1 ch -> 1 ch, pad 1) on each head: 9 masked shifted
            # FMAs along the flattened lane axis.  wmask_ref[t] already holds
            # tap_weight[k, t] * boundary_mask[t, :] per head k.
            acc = jnp.zeros_like(z)
            for t in range(n_taps):
                s = shifts[t]
                zt = z if s == 0 else pltpu.roll(z, shift=s, axis=1)
                acc = acc + wmask_ref[t] * zt                       # (3, L)

            # basicBlock_dual output ReLU, then cross_modal sigmoid.
            a = jax.nn.sigmoid(jnp.maximum(acc + bb, 0.0))          # (3, L)

            # x1_out = x1 * (1 + a1*a3), x2_out = x2 * (1 + a2*a3)
            s1 = 1.0 + a[0:1, :] * a[2:3, :]                        # (1, L)
            s2 = 1.0 + a[1:2, :] * a[2:3, :]                        # (1, L)

            # Final 1x1 conv on cat([x1_out, x2_out]), split into two halves.
            out = (jnp.dot(wc1, x1 * s1, preferred_element_type=jnp.float32)
                   + jnp.dot(wc2, x2 * s2, preferred_element_type=jnp.float32)
                   + bc)                                            # (cout, L)
            o_ref[n] = out.astype(o_ref.dtype)

    return kernel


def cross_modal_pallas(x1, x2, params):
    B, cin, H, W = x1.shape
    assert x2.shape == x1.shape
    L = H * W
    wc = params['wc']
    cout = wc.shape[0]
    assert wc.shape == (cout, 2 * cin, 1, 1)

    nb = _pick_block_batch(B)
    grid = (B // nb,)

    # Lane-dense flatten (free: only collapses the trailing H, W dims).
    x1f = x1.reshape(B, cin, L)
    x2f = x2.reshape(B, cin, L)

    # Fused first-1x1 weights: head0 <- x1, head1 <- x2, head2 <- x1 + x2.
    w1a = params['w1a'][0, :, 0, 0]
    w2a = params['w2a'][0, :, 0, 0]
    w3a = params['w3a'][0, :, 0, 0]
    zeros = jnp.zeros_like(w1a)
    wa1 = jnp.stack([w1a, zeros, w3a], axis=0)                      # (3, cin)
    wa2 = jnp.stack([zeros, w2a, w3a], axis=0)                      # (3, cin)
    ba = jnp.stack([params['b1a'][0], params['b2a'][0],
                    params['b3a'][0]]).reshape(3, 1)

    # 3x3 conv taps -> per-tap (weight * boundary-mask) planes + lane shifts.
    taps = jnp.stack([params['w1b'][0, 0].reshape(9),
                      params['w2b'][0, 0].reshape(9),
                      params['w3b'][0, 0].reshape(9)], axis=0)      # (3, 9)
    rr = jnp.arange(H)[:, None]
    cc = jnp.arange(W)[None, :]
    masks, shifts = [], []
    for dy in (-1, 0, 1):
        for dx in (-1, 0, 1):
            valid = ((rr + dy >= 0) & (rr + dy < H) &
                     (cc + dx >= 0) & (cc + dx < W))
            masks.append(valid.astype(jnp.float32).reshape(L))
            # want shifted[p] = z[p + dy*W + dx]  ->  roll by -(dy*W + dx)
            shifts.append((-(dy * W + dx)) % L)
    mask = jnp.stack(masks, axis=0)                                 # (9, L)
    wmask = taps.T[:, :, None] * mask[:, None, :]                   # (9, 3, L)

    bb = jnp.stack([params['b1b'][0], params['b2b'][0],
                    params['b3b'][0]]).reshape(3, 1)

    wc1 = wc[:, :cin, 0, 0]                                         # (cout, cin)
    wc2 = wc[:, cin:, 0, 0]                                         # (cout, cin)
    bc = params['bc'].reshape(cout, 1)

    kernel = _make_kernel(nb, cin, cout, L, tuple(shifts))

    def fixed(shape):
        ndim = len(shape)
        return pl.BlockSpec(shape, lambda b: (0,) * ndim)

    grid_spec = pltpu.PrefetchScalarGridSpec(
        num_scalar_prefetch=0,
        grid=grid,
        in_specs=[
            pl.BlockSpec((nb, cin, L), lambda b: (b, 0, 0)),   # x1 (lane-dense)
            pl.BlockSpec((nb, cin, L), lambda b: (b, 0, 0)),   # x2 (lane-dense)
            fixed((3, cin)),        # wa1
            fixed((3, cin)),        # wa2
            fixed((3, 1)),          # ba
            fixed((9, 3, L)),       # tap-weight * boundary-mask planes
            fixed((3, 1)),          # bb
            fixed((cout, cin)),     # wc1
            fixed((cout, cin)),     # wc2
            fixed((cout, 1)),       # bc
        ],
        out_specs=pl.BlockSpec((nb, cout, L), lambda b: (b, 0, 0)),
    )

    out = pl.pallas_call(
        kernel,
        out_shape=jax.ShapeDtypeStruct((B, cout, L), jnp.float32),
        grid_spec=grid_spec,
        compiler_params=pltpu.CompilerParams(
            dimension_semantics=("parallel",)),
    )(x1f, x2f, wa1, wa2, ba, wmask, bb, wc1, wc2, bc)
    return out.reshape(B, cout, H, W)


def cross_modal_reference(x1, x2, params):
    """Pure-JAX reference mirroring the PyTorch forward (for validation)."""
    dn = ('NCHW', 'OIHW', 'NCHW')
    prec = lax.Precision.HIGHEST

    def basic(x, wa, ba_, wb, bb_):
        y = lax.conv_general_dilated(x, wa, (1, 1), 'VALID',
                                     dimension_numbers=dn, precision=prec)
        y = jnp.maximum(y + ba_[None, :, None, None], 0.0)
        y = lax.conv_general_dilated(y, wb, (1, 1), 'SAME',
                                     dimension_numbers=dn, precision=prec)
        return jnp.maximum(y + bb_[None, :, None, None], 0.0)

    a1 = jax.nn.sigmoid(basic(x1, params['w1a'], params['b1a'],
                              params['w1b'], params['b1b']))
    a2 = jax.nn.sigmoid(basic(x2, params['w2a'], params['b2a'],
                              params['w2b'], params['b2b']))
    a3 = jax.nn.sigmoid(basic(x1 + x2, params['w3a'], params['b3a'],
                              params['w3b'], params['b3b']))
    x1_out = x1 + a3 * (a1 * x1)
    x2_out = x2 + a3 * (a2 * x2)
    xc = jnp.concatenate([x1_out, x2_out], axis=1)
    out = lax.conv_general_dilated(xc, params['wc'], (1, 1), 'VALID',
                                   dimension_numbers=dn, precision=prec)
    return out + params['bc'][None, :, None, None]


if __name__ == "__main__":
    B, cin, H, W = 2, 4, 16, 16    # x1, x2: (B, in_channels, H, W)
    cout = 8                       # out_channels of the final 1x1 conv

    key = jax.random.PRNGKey(0)
    ks = jax.random.split(key, 16)
    params = {
        'w1a': 0.2 * jax.random.normal(ks[0],  (1, cin, 1, 1), jnp.float32),
        'b1a': 0.1 * jax.random.normal(ks[1],  (1,), jnp.float32),
        'w1b': 0.2 * jax.random.normal(ks[2],  (1, 1, 3, 3), jnp.float32),
        'b1b': 0.1 * jax.random.normal(ks[3],  (1,), jnp.float32),
        'w2a': 0.2 * jax.random.normal(ks[4],  (1, cin, 1, 1), jnp.float32),
        'b2a': 0.1 * jax.random.normal(ks[5],  (1,), jnp.float32),
        'w2b': 0.2 * jax.random.normal(ks[6],  (1, 1, 3, 3), jnp.float32),
        'b2b': 0.1 * jax.random.normal(ks[7],  (1,), jnp.float32),
        'w3a': 0.2 * jax.random.normal(ks[8],  (1, cin, 1, 1), jnp.float32),
        'b3a': 0.1 * jax.random.normal(ks[9],  (1,), jnp.float32),
        'w3b': 0.2 * jax.random.normal(ks[10], (1, 1, 3, 3), jnp.float32),
        'b3b': 0.1 * jax.random.normal(ks[11], (1,), jnp.float32),
        'wc':  0.2 * jax.random.normal(ks[12], (cout, 2 * cin, 1, 1), jnp.float32),
        'bc':  0.1 * jax.random.normal(ks[13], (cout,), jnp.float32),
    }
    x1 = jax.random.normal(ks[14], (B, cin, H, W), jnp.float32)
    x2 = jax.random.normal(ks[15], (B, cin, H, W), jnp.float32)

    out = jax.block_until_ready(cross_modal_pallas(x1, x2, params))
    ref = cross_modal_reference(x1, x2, params)
    assert out.shape == ref.shape == (B, cout, H, W)
    max_diff = float(jnp.max(jnp.abs(out - ref)))
    assert max_diff < 3e-2, f"max abs diff too large: {max_diff}"

    print("KERNEL_OK")
</pallas_src>

<mosaic_0001>
module attributes {stable_mosaic.version = 11 : i64} {
  func.func @kernel(%arg0: i32, %arg1: memref<1x4x256xf32, #tpu.memory_space<vmem>>, %arg2: memref<1x4x256xf32, #tpu.memory_space<vmem>>, %arg3: memref<3x4xf32, #tpu.memory_space<vmem>>, %arg4: memref<3x4xf32, #tpu.memory_space<vmem>>, %arg5: memref<3x1xf32, #tpu.memory_space<vmem>>, %arg6: memref<9x3x256xf32, #tpu.memory_space<vmem>>, %arg7: memref<3x1xf32, #tpu.memory_space<vmem>>, %arg8: memref<8x4xf32, #tpu.memory_space<vmem>>, %arg9: memref<8x4xf32, #tpu.memory_space<vmem>>, %arg10: memref<8x1xf32, #tpu.memory_space<vmem>>, %arg11: memref<1x8x256xf32, #tpu.memory_space<vmem>>) attributes {dimension_semantics = [#tpu.dimension_semantics<parallel>], iteration_bounds = array<i64: 2>, scalar_prefetch = 0 : i64, scratch_operands = 0 : i64, tpu.core_type = #tpu.core_type<tc>, window_params = [{transform_indices = @transform_0, window_bounds = array<i64: 1, 4, 256>}, {transform_indices = @transform_1, window_bounds = array<i64: 1, 4, 256>}, {pipeline_mode = #tpu.pipeline_mode<synchronous>, transform_indices = @transform_2, window_bounds = array<i64: 3, 4>}, {pipeline_mode = #tpu.pipeline_mode<synchronous>, transform_indices = @transform_3, window_bounds = array<i64: 3, 4>}, {pipeline_mode = #tpu.pipeline_mode<synchronous>, transform_indices = @transform_4, window_bounds = array<i64: 3, 1>}, {pipeline_mode = #tpu.pipeline_mode<synchronous>, transform_indices = @transform_5, window_bounds = array<i64: 9, 3, 256>}, {pipeline_mode = #tpu.pipeline_mode<synchronous>, transform_indices = @transform_6, window_bounds = array<i64: 3, 1>}, {pipeline_mode = #tpu.pipeline_mode<synchronous>, transform_indices = @transform_7, window_bounds = array<i64: 8, 4>}, {pipeline_mode = #tpu.pipeline_mode<synchronous>, transform_indices = @transform_8, window_bounds = array<i64: 8, 4>}, {pipeline_mode = #tpu.pipeline_mode<synchronous>, transform_indices = @transform_9, window_bounds = array<i64: 8, 1>}, {transform_indices = @transform_10, window_bounds = array<i64: 1, 8, 256>}]} {
    %c0 = arith.constant 0 : index
    %c0_0 = arith.constant 0 : index
    %0 = vector.load %arg3[%c0, %c0_0] : memref<3x4xf32, #tpu.memory_space<vmem>>, vector<3x4xf32>
    %c0_1 = arith.constant 0 : index
    %c0_2 = arith.constant 0 : index
    %1 = vector.load %arg4[%c0_1, %c0_2] : memref<3x4xf32, #tpu.memory_space<vmem>>, vector<3x4xf32>
    %c0_3 = arith.constant 0 : index
    %c0_4 = arith.constant 0 : index
    %2 = vector.load %arg5[%c0_3, %c0_4] : memref<3x1xf32, #tpu.memory_space<vmem>>, vector<3x1xf32>
    %c0_5 = arith.constant 0 : index
    %c0_6 = arith.constant 0 : index
    %3 = vector.load %arg7[%c0_5, %c0_6] : memref<3x1xf32, #tpu.memory_space<vmem>>, vector<3x1xf32>
    %c0_7 = arith.constant 0 : index
    %c0_8 = arith.constant 0 : index
    %4 = vector.load %arg8[%c0_7, %c0_8] : memref<8x4xf32, #tpu.memory_space<vmem>>, vector<8x4xf32>
    %c0_9 = arith.constant 0 : index
    %c0_10 = arith.constant 0 : index
    %5 = vector.load %arg9[%c0_9, %c0_10] : memref<8x4xf32, #tpu.memory_space<vmem>>, vector<8x4xf32>
    %c0_11 = arith.constant 0 : index
    %c0_12 = arith.constant 0 : index
    %6 = vector.load %arg10[%c0_11, %c0_12] : memref<8x1xf32, #tpu.memory_space<vmem>>, vector<8x1xf32>
    %c0_13 = arith.constant 0 : index
    %c0_14 = arith.constant 0 : index
    %c0_15 = arith.constant 0 : index
    %7 = vector.load %arg1[%c0_13, %c0_14, %c0_15] : memref<1x4x256xf32, #tpu.memory_space<vmem>>, vector<1x4x256xf32>
    %8 = vector.shape_cast %7 : vector<1x4x256xf32> to vector<4x256xf32>
    %c0_16 = arith.constant 0 : index
    %c0_17 = arith.constant 0 : index
    %c0_18 = arith.constant 0 : index
    %9 = vector.load %arg2[%c0_16, %c0_17, %c0_18] : memref<1x4x256xf32, #tpu.memory_space<vmem>>, vector<1x4x256xf32>
    %10 = vector.shape_cast %9 : vector<1x4x256xf32> to vector<4x256xf32>
    %cst = arith.constant dense<0.000000e+00> : vector<3x256xf32>
    %11 = tpu.matmul %0, %8, %cst {dimension_numbers = #tpu.dot_dimension_numbers<[1], [0], [0], [1], [0, 0, 1, 1], [], []>} : vector<3x4xf32>, vector<4x256xf32>, vector<3x256xf32> -> vector<3x256xf32>
    %cst_19 = arith.constant dense<0.000000e+00> : vector<3x256xf32>
    %12 = tpu.matmul %1, %10, %cst_19 {dimension_numbers = #tpu.dot_dimension_numbers<[1], [0], [0], [1], [0, 0, 1, 1], [], []>} : vector<3x4xf32>, vector<4x256xf32>, vector<3x256xf32> -> vector<3x256xf32>
    %13 = arith.addf %11, %12 : vector<3x256xf32>
    %14 = vector.broadcast %2 : vector<3x1xf32> to vector<3x256xf32>
    %15 = arith.addf %13, %14 : vector<3x256xf32>
    %cst_20 = arith.constant 0.000000e+00 : f32
    %16 = vector.broadcast %cst_20 : f32 to vector<3x256xf32>
    %17 = arith.maximumf %15, %16 : vector<3x256xf32>
    %cst_21 = arith.constant 0.000000e+00 : f32
    %18 = vector.broadcast %cst_21 : f32 to vector<3x256xf32>
    %c17_i32 = arith.constant 17 : i32
    %19 = tpu.dynamic_rotate %17 by %c17_i32 dim 1 : vector<3x256xf32>, i32 -> vector<3x256xf32>
    %c0_22 = arith.constant 0 : index
    %c0_23 = arith.constant 0 : index
    %c0_24 = arith.constant 0 : index
    %20 = vector.load %arg6[%c0_22, %c0_23, %c0_24] : memref<9x3x256xf32, #tpu.memory_space<vmem>>, vector<1x3x256xf32>
    %21 = vector.shape_cast %20 : vector<1x3x256xf32> to vector<3x256xf32>
    %22 = arith.mulf %21, %19 : vector<3x256xf32>
    %23 = arith.addf %18, %22 : vector<3x256xf32>
    %c16_i32 = arith.constant 16 : i32
    %24 = tpu.dynamic_rotate %17 by %c16_i32 dim 1 : vector<3x256xf32>, i32 -> vector<3x256xf32>
    %c1 = arith.constant 1 : index
    %c0_25 = arith.constant 0 : index
    %c0_26 = arith.constant 0 : index
    %25 = vector.load %arg6[%c1, %c0_25, %c0_26] : memref<9x3x256xf32, #tpu.memory_space<vmem>>, vector<1x3x256xf32>
    %26 = vector.shape_cast %25 : vector<1x3x256xf32> to vector<3x256xf32>
    %27 = arith.mulf %26, %24 : vector<3x256xf32>
    %28 = arith.addf %23, %27 : vector<3x256xf32>
    %c15_i32 = arith.constant 15 : i32
    %29 = tpu.dynamic_rotate %17 by %c15_i32 dim 1 : vector<3x256xf32>, i32 -> vector<3x256xf32>
    %c2 = arith.constant 2 : index
    %c0_27 = arith.constant 0 : index
    %c0_28 = arith.constant 0 : index
    %30 = vector.load %arg6[%c2, %c0_27, %c0_28] : memref<9x3x256xf32, #tpu.memory_space<vmem>>, vector<1x3x256xf32>
    %31 = vector.shape_cast %30 : vector<1x3x256xf32> to vector<3x256xf32>
    %32 = arith.mulf %31, %29 : vector<3x256xf32>
    %33 = arith.addf %28, %32 : vector<3x256xf32>
    %c1_i32 = arith.constant 1 : i32
    %34 = tpu.dynamic_rotate %17 by %c1_i32 dim 1 : vector<3x256xf32>, i32 -> vector<3x256xf32>
    %c3 = arith.constant 3 : index
    %c0_29 = arith.constant 0 : index
    %c0_30 = arith.constant 0 : index
    %35 = vector.load %arg6[%c3, %c0_29, %c0_30] : memref<9x3x256xf32, #tpu.memory_space<vmem>>, vector<1x3x256xf32>
    %36 = vector.shape_cast %35 : vector<1x3x256xf32> to vector<3x256xf32>
    %37 = arith.mulf %36, %34 : vector<3x256xf32>
    %38 = arith.addf %33, %37 : vector<3x256xf32>
    %c4 = arith.constant 4 : index
    %c0_31 = arith.constant 0 : index
    %c0_32 = arith.constant 0 : index
    %39 = vector.load %arg6[%c4, %c0_31, %c0_32] : memref<9x3x256xf32, #tpu.memory_space<vmem>>, vector<1x3x256xf32>
    %40 = vector.shape_cast %39 : vector<1x3x256xf32> to vector<3x256xf32>
    %41 = arith.mulf %40, %17 : vector<3x256xf32>
    %42 = arith.addf %38, %41 : vector<3x256xf32>
    %c255_i32 = arith.constant 255 : i32
    %43 = tpu.dynamic_rotate %17 by %c255_i32 dim 1 : vector<3x256xf32>, i32 -> vector<3x256xf32>
    %c5 = arith.constant 5 : index
    %c0_33 = arith.constant 0 : index
    %c0_34 = arith.constant 0 : index
    %44 = vector.load %arg6[%c5, %c0_33, %c0_34] : memref<9x3x256xf32, #tpu.memory_space<vmem>>, vector<1x3x256xf32>
    %45 = vector.shape_cast %44 : vector<1x3x256xf32> to vector<3x256xf32>
    %46 = arith.mulf %45, %43 : vector<3x256xf32>
    %47 = arith.addf %42, %46 : vector<3x256xf32>
    %c241_i32 = arith.constant 241 : i32
    %48 = tpu.dynamic_rotate %17 by %c241_i32 dim 1 : vector<3x256xf32>, i32 -> vector<3x256xf32>
    %c6 = arith.constant 6 : index
    %c0_35 = arith.constant 0 : index
    %c0_36 = arith.constant 0 : index
    %49 = vector.load %arg6[%c6, %c0_35, %c0_36] : memref<9x3x256xf32, #tpu.memory_space<vmem>>, vector<1x3x256xf32>
    %50 = vector.shape_cast %49 : vector<1x3x256xf32> to vector<3x256xf32>
    %51 = arith.mulf %50, %48 : vector<3x256xf32>
    %52 = arith.addf %47, %51 : vector<3x256xf32>
    %c240_i32 = arith.constant 240 : i32
    %53 = tpu.dynamic_rotate %17 by %c240_i32 dim 1 : vector<3x256xf32>, i32 -> vector<3x256xf32>
    %c7 = arith.constant 7 : index
    %c0_37 = arith.constant 0 : index
    %c0_38 = arith.constant 0 : index
    %54 = vector.load %arg6[%c7, %c0_37, %c0_38] : memref<9x3x256xf32, #tpu.memory_space<vmem>>, vector<1x3x256xf32>
    %55 = vector.shape_cast %54 : vector<1x3x256xf32> to vector<3x256xf32>
    %56 = arith.mulf %55, %53 : vector<3x256xf32>
    %57 = arith.addf %52, %56 : vector<3x256xf32>
    %c239_i32 = arith.constant 239 : i32
    %58 = tpu.dynamic_rotate %17 by %c239_i32 dim 1 : vector<3x256xf32>, i32 -> vector<3x256xf32>
    %c8 = arith.constant 8 : index
    %c0_39 = arith.constant 0 : index
    %c0_40 = arith.constant 0 : index
    %59 = vector.load %arg6[%c8, %c0_39, %c0_40] : memref<9x3x256xf32, #tpu.memory_space<vmem>>, vector<1x3x256xf32>
    %60 = vector.shape_cast %59 : vector<1x3x256xf32> to vector<3x256xf32>
    %61 = arith.mulf %60, %58 : vector<3x256xf32>
    %62 = arith.addf %57, %61 : vector<3x256xf32>
    %63 = vector.broadcast %3 : vector<3x1xf32> to vector<3x256xf32>
    %64 = arith.addf %62, %63 : vector<3x256xf32>
    %cst_41 = arith.constant 0.000000e+00 : f32
    %65 = vector.broadcast %cst_41 : f32 to vector<3x256xf32>
    %66 = arith.maximumf %64, %65 : vector<3x256xf32>
    %67 = arith.negf %66 : vector<3x256xf32>
    %68 = math.exp %67 : vector<3x256xf32>
    %cst_42 = arith.constant 1.000000e+00 : f32
    %69 = vector.broadcast %cst_42 : f32 to vector<3x256xf32>
    %70 = arith.addf %69, %68 : vector<3x256xf32>
    %71 = arith.divf %69, %70 : vector<3x256xf32>
    %72 = vector.extract_strided_slice %71 {offsets = [0, 0], sizes = [1, 256], strides = [1, 1]} : vector<3x256xf32> to vector<1x256xf32>
    %73 = vector.extract_strided_slice %71 {offsets = [2, 0], sizes = [1, 256], strides = [1, 1]} : vector<3x256xf32> to vector<1x256xf32>
    %74 = arith.mulf %72, %73 : vector<1x256xf32>
    %cst_43 = arith.constant 1.000000e+00 : f32
    %75 = vector.broadcast %cst_43 : f32 to vector<1x256xf32>
    %76 = arith.addf %75, %74 : vector<1x256xf32>
    %77 = vector.extract_strided_slice %71 {offsets = [1, 0], sizes = [1, 256], strides = [1, 1]} : vector<3x256xf32> to vector<1x256xf32>
    %78 = vector.extract_strided_slice %71 {offsets = [2, 0], sizes = [1, 256], strides = [1, 1]} : vector<3x256xf32> to vector<1x256xf32>
    %79 = arith.mulf %77, %78 : vector<1x256xf32>
    %cst_44 = arith.constant 1.000000e+00 : f32
    %80 = vector.broadcast %cst_44 : f32 to vector<1x256xf32>
    %81 = arith.addf %80, %79 : vector<1x256xf32>
    %82 = vector.broadcast %76 : vector<1x256xf32> to vector<4x256xf32>
    %83 = arith.mulf %8, %82 : vector<4x256xf32>
    %cst_45 = arith.constant dense<0.000000e+00> : vector<8x256xf32>
    %84 = tpu.matmul %4, %83, %cst_45 {dimension_numbers = #tpu.dot_dimension_numbers<[1], [0], [0], [1], [0, 0, 1, 1], [], []>} : vector<8x4xf32>, vector<4x256xf32>, vector<8x256xf32> -> vector<8x256xf32>
    %85 = vector.broadcast %81 : vector<1x256xf32> to vector<4x256xf32>
    %86 = arith.mulf %10, %85 : vector<4x256xf32>
    %cst_46 = arith.constant dense<0.000000e+00> : vector<8x256xf32>
    %87 = tpu.matmul %5, %86, %cst_46 {dimension_numbers = #tpu.dot_dimension_numbers<[1], [0], [0], [1], [0, 0, 1, 1], [], []>} : vector<8x4xf32>, vector<4x256xf32>, vector<8x256xf32> -> vector<8x256xf32>
    %88 = arith.addf %84, %87 : vector<8x256xf32>
    %89 = vector.broadcast %6 : vector<8x1xf32> to vector<8x256xf32>
    %90 = arith.addf %88, %89 : vector<8x256xf32>
    %c0_47 = arith.constant 0 : index
    %c0_48 = arith.constant 0 : index
    %c0_49 = arith.constant 0 : index
    %91 = vector.load %arg11[%c0_47, %c0_48, %c0_49] : memref<1x8x256xf32, #tpu.memory_space<vmem>>, vector<1x8x256xf32>
    %92 = vector.shape_cast %91 : vector<1x8x256xf32> to vector<8x256xf32>
    %93 = vector.shape_cast %90 : vector<8x256xf32> to vector<1x8x256xf32>
    tpu.vector_store %arg11[%c0_47, %c0_48, %c0_49], %93 {strides = array<i32>} : memref<1x8x256xf32, #tpu.memory_space<vmem>>, vector<1x8x256xf32>,
    return
  }
  func.func @transform_0(%arg0: i32) -> (i32, i32, i32) {
    %c0_i32 = arith.constant 0 : i32
    %c0_i32_0 = arith.constant 0 : i32
    %c0_i32_1 = arith.constant 0 : i32
    return %arg0, %c0_i32, %c0_i32_0 : i32, i32, i32
  }
  func.func @transform_1(%arg0: i32) -> (i32, i32, i32) {
    %c0_i32 = arith.constant 0 : i32
    %c0_i32_0 = arith.constant 0 : i32
    %c0_i32_1 = arith.constant 0 : i32
    return %arg0, %c0_i32, %c0_i32_0 : i32, i32, i32
  }
  func.func @transform_2(%arg0: i32) -> (i32, i32) {
    %c0_i32 = arith.constant 0 : i32
    %c0_i32_0 = arith.constant 0 : i32
    %c0_i32_1 = arith.constant 0 : i32
    return %c0_i32, %c0_i32_0 : i32, i32
  }
  func.func @transform_3(%arg0: i32) -> (i32, i32) {
    %c0_i32 = arith.constant 0 : i32
    %c0_i32_0 = arith.constant 0 : i32
    %c0_i32_1 = arith.constant 0 : i32
    return %c0_i32, %c0_i32_0 : i32, i32
  }
  func.func @transform_4(%arg0: i32) -> (i32, i32) {
    %c0_i32 = arith.constant 0 : i32
    %c0_i32_0 = arith.constant 0 : i32
    %c0_i32_1 = arith.constant 0 : i32
    return %c0_i32, %c0_i32_0 : i32, i32
  }
  func.func @transform_5(%arg0: i32) -> (i32, i32, i32) {
    %c0_i32 = arith.constant 0 : i32
    %c0_i32_0 = arith.constant 0 : i32
    %c0_i32_1 = arith.constant 0 : i32
    %c0_i32_2 = arith.constant 0 : i32
    return %c0_i32, %c0_i32_0, %c0_i32_1 : i32, i32, i32
  }
  func.func @transform_6(%arg0: i32) -> (i32, i32) {
    %c0_i32 = arith.constant 0 : i32
    %c0_i32_0 = arith.constant 0 : i32
    %c0_i32_1 = arith.constant 0 : i32
    return %c0_i32, %c0_i32_0 : i32, i32
  }
  func.func @transform_7(%arg0: i32) -> (i32, i32) {
    %c0_i32 = arith.constant 0 : i32
    %c0_i32_0 = arith.constant 0 : i32
    %c0_i32_1 = arith.constant 0 : i32
    return %c0_i32, %c0_i32_0 : i32, i32
  }
  func.func @transform_8(%arg0: i32) -> (i32, i32) {
    %c0_i32 = arith.constant 0 : i32
    %c0_i32_0 = arith.constant 0 : i32
    %c0_i32_1 = arith.constant 0 : i32
    return %c0_i32, %c0_i32_0 : i32, i32
  }
  func.func @transform_9(%arg0: i32) -> (i32, i32) {
    %c0_i32 = arith.constant 0 : i32
    %c0_i32_0 = arith.constant 0 : i32
    %c0_i32_1 = arith.constant 0 : i32
    return %c0_i32, %c0_i32_0 : i32, i32
  }
  func.func @transform_10(%arg0: i32) -> (i32, i32, i32) {
    %c0_i32 = arith.constant 0 : i32
    %c0_i32_0 = arith.constant 0 : i32
    %c0_i32_1 = arith.constant 0 : i32
    return %arg0, %c0_i32, %c0_i32_0 : i32, i32, i32
  }
}

</mosaic_0001>

<bundles_post_ra>
// kernel: tpu_custom_call.1
= control target key start
LH: loop header
LB: loop body
LE: loop exit
PB: predicated region body
PF: predicated region fallthrough
CT: control target
= control target key end

     0   :  { %15 = vsyncpa [#allocation3], 0  ;;  %s1545_s0 = inlined_call_operand.vmem [shape: f32[2,4,256], index: 0, kind: input, shape index: {}]   ;;  %s1546_s1 = inlined_call_operand.vmem [shape: f32[2,4,256], index: 1, kind: input, shape index: {}]   ;;  %s1547_s2 = inlined_call_operand.vmem [shape: f32[3,4], index: 2, kind: input, shape index: {}]   ;;  %s1548_s3 = inlined_call_operand.vmem [shape: f32[3,4], index: 3, kind: input, shape index: {}]   ;;  %s1549_s4 = inlined_call_operand.vmem [shape: f32[3,1], index: 4, kind: input, shape index: {}]   ;;  %s1550_s5 = inlined_call_operand.hbm [shape: f32[9,3,256], index: 5, kind: input, shape index: {}]   ;;  %s1551_s6 = inlined_call_operand.vmem [shape: f32[3,1], index: 6, kind: input, shape index: {}]   ;;  %s1552_s7 = inlined_call_operand.vmem [shape: f32[8,4], index: 7, kind: input, shape index: {}]   ;;  %s1553_s8 = inlined_call_operand.vmem [shape: f32[8,4], index: 8, kind: input, shape index: {}]   ;;  %s1554_s9 = inlined_call_operand.vmem [shape: f32[8,1], index: 9, kind: input, shape index: {}]   ;;  %s1555_s10 = inlined_call_operand.hbm [shape: f32[2,8,256], index: 10, kind: output, shape index: {}]  }
   0x1   :  { %16 = vsyncpa [#allocation4], 0 }
   0x2   :  { %18 = vsyncpa [#allocation4 + $0x1], 0  ;;  %s1323_s13 = smov 0   ;;  %s1325_s14 = smov 0  }
   0x3   :  { %s1327_s15 = smov 0   ;;  %s1329_s16 = smov 0  }
   0x4 LB: > { %s1344_s17 = sadd.s32 4294967295, %s1251_s16   ;;  %s1048_s18 = sadd.s32 4294967294, %s1251_s16   ;;  %s1251_s16 = sphi %s1329_s16, %s1571_s16   ;;  %s1247_s15 = sphi %s1327_s15, %s1570_s15   ;;  %s1243_s14 = sphi %s1325_s14, %s1569_s14   ;;  %s1239_s13 = sphi %s1323_s13, %s1568_s13  }
   0x5   : > { %s1348_s19 = sadd.s32 1, %s1251_s16   ;;  %s251_s20 = sadd.s32 1, %s1247_s15 }
   0x6   : > { %s248_s21 = ssub.s32 %s1251_s16, %s1348_s19  ;;  %p261_p0 = scmp.ne.s32.totalorder %s1247_s15, %s1243_s14 }
   0x7   : > { %p249_p1 = scmp.eq.s32.totalorder %s248_s21, 0  ;;  %p262_p2 = scmp.eq.s32.totalorder %s1344_s17, 1 }
   0x8   : > { %p267_p3 = scmp.ne.s32.totalorder %s1243_s14, %s1239_s13  ;;  %p268_p4 = scmp.eq.s32.totalorder %s1048_s18, 1 }
   0x9   : > { %s1359_s22 = scalar_select %p249_p1, %s1247_s15, %s251_s20  }
   0xa   : > { %p1361_p5 = por %p262_p2, %p261_p0  ;;  %p1365_p6 = por %p268_p4, %p267_p3 }
   0xb   : > { %p1049_p7 = scmp.ge.s32.totalorder %s1251_s16, 1  ;;  %p275_p8 = scmp.lt.s32.totalorder %s1251_s16, 3 }
   0xc   : > { %s1559_s23 = scalar_select %p1361_p5, 1, 0 }
   0xd   : > { %s1560_s24 = scalar_select %p1365_p6, 1, 0 }
   0xe   : > { %p1556_p9 = scmp.eq.s32.totalorder %s1344_s17, 0  ;;  %p1372_p10 = pnand %p1049_p7, %p275_p8 }
   0xf   : > { %s1253_s26 = smov [#allocation2]   ;;  %s1157_s11 = scalar_lea.hbm %s1550_s5, 1152 }
  0x10   : > { %s1561_s25 = scalar_select %p1372_p10, 1, 0 }
  0x11   : > { %s296_s27 = sshll.u32 %s1253_s26, 4  ;;  %p1092_p11 = pneg %p1372_p10  ;;  %s297_s27 = int_to_ptr.vmem [resolvable:$true] %s296_s27 }
  0x12   : > { %p1158_p13 = scmp.ne.s32.totalorder %s1550_s5, %s1157_s11  ;;  %p1164_p3 = scmp.lt.u32.totalorder %s1157_s11, %s1550_s5 }
  0x13   : > { %p1380_p12 = pnand %p1556_p9, %p1092_p11 }
  0x15   : > { %p1159_p0 = pneg %p1380_p12 }
  0x17   : > { %p1160_p1 = pnand %p1159_p0, %p1158_p13 }
  0x19   : > { %p1161_p2 = pneg %p1160_p1 }
  0x1b   : > { %p1166_p4 = pnand %p1164_p3, %p1161_p2 }
  0x1d   : > { %1169 = shalt.err (!%p1166_p4)
}
  0x1e   : > { %s1170_s26 = scalar_lea.vmem %s297_s27, 1152  ;;  %p1178_p9 = scmp.lt.s32.totalorder %s297_s27, %s297_s27 }
  0x1f   : > { %p1171_p7 = scmp.ne.s32.totalorder %s297_s27, %s1170_s26  ;;  %p1179_p6 = scmp.lt.s32.totalorder %s1170_s26, %s1170_s26 }
  0x21   : > { %p1173_p8 = pnand %p1171_p7, %p1159_p0  ;;  %p1180_p5 = por %p1179_p6, %p1178_p9 }
  0x23   : > { %p1174_p11 = pneg %p1173_p8 }
  0x25   : > { %p1181_p10 = pnand %p1180_p5, %p1174_p11 }
  0x27   : > { %1184 = shalt.err (!%p1181_p10)
}
  0x28   : > { %s1254_s29 = smov 128   ;;  %s1255_s30 = smov 8  }
  0x29   : > { %1095 = dma.hbm_to_vmem [thread:$0]  (!%p1380_p12), %s1550_s5, 1152, %s297_s27, [#allocation3], %s1254_s29, %s1254_s29, %s1255_s30  }
  0x2a   : > { %p1563_p13 = scmp.ne.s32.totalorder %s1561_s25, 0 }
  0x2b   : > { %p1564_p1 = scmp.eq.s32.totalorder (!%p1563_p13), %s1344_s17, 0 }
  0x2c   : > { %340 = sbr.rel (%p1563_p13) target bundleno = 740 (0x2e4), region = 60 }
  0x33   : > { %1230 = dma.done.wait (%p1564_p1), [#allocation3], 1152   ;;  %p1565_p0 = pmov %p1564_p1 }
  0x34   : > { %p383_p5 = scmp.lt.s32.totalorder %s1344_s17, 1  ;;  %v1256_v0 = vmov 0.0   ;;  %v1257_v1 = vmov 0   ;;  %vm408_vm0 = vcmask 1043456   ;;  %v395_v6 = vld [vmem:[%s1549_s4] sm:$0x7]  ;;  %v577_v22 = vlaneseq }
  0x35   : > { %1232 = vsyncadd (%p1565_p0), [#allocation3], 4294966144  ;;  %477 = vmatprep.mubr.f32.mxu0 %v1256_v0  ;;  %854 = vmatprep.mubr.f32.mxu1 %v1256_v0  ;;  %v394_v7 = vld [vmem:[%s1548_s3] sm:$0x7]  ;;  %vm404_vm1 = vcmask 31744   ;;  %s1258_s11 = smov 16  }
  0x36   : > { %s384_s28 = scalar_select %p383_p5, %s1344_s17, 1  ;;  %1149 = vset.pattern.permute.xlu0 %v1257_v1  ;;  %1150 = vset.pattern.permute.xlu1 %v1257_v1  ;;  %v393_v8 = vld [vmem:[%s1547_s2] sm:$0x7]  ;;  %v1470_v25 = vand.u32 127, %v577_v22  ;;  %v597_v37 = vld [vmem:[#allocation2 + $0x8] sm:$0x77] }
  0x37   : > { %566 = vperm.xlu0 %1149, %v395_v6   ;;  %s1260_s21 = smov 15   ;;  %s1261_s26 = smov 1   ;;  %v396_v17 = vld [vmem:[%s1551_s6] sm:$0x7]  ;;  %v612_v43 = vld [vmem:[#allocation2 + $0x10] sm:$0x77] }
  0x38   : > { %s1079_s25 = sshll.u32 %s384_s28, 3  ;;  %s1263_s30 = smov 113   ;;  %v399_v18 = vld [vmem:[%s1554_s9] sm:$0xff]  ;;  %vm593_vm2 = vcmp.lt.s32.totalorder %v1470_v25, 16  ;;  %vm579_vm3 = vcmp.lt.s32.totalorder %v1470_v25, 17  ;;  %vm608_vm4 = vcmp.lt.s32.totalorder %v1470_v25, 15 }
  0x39   : > { %s387_s20 = scalar_lea.vmem %s1545_s0, %s1079_s25  ;;  %s392_s29 = scalar_lea.vmem %s1546_s1, %s1079_s25  ;;  %v582_v33 = vld [vmem:[#allocation2] sm:$0x77]  ;;  %vm623_vm5 = vcmp.lt.s32.totalorder %v1470_v25, 1  ;;  %v627_v50 = vld [vmem:[#allocation2 + $0x18] sm:$0x77]  ;;  %vm646_vm6 = vcmp.lt.s32.totalorder %v1470_v25, 127 }
  0x3a   : > { %v1416_v2 = vld [vmem:[%s387_s20] sm:$0xff]  ;;  %s1259_s20 = smov 17   ;;  %s1264_s12 = smov 112   ;;  %vm661_vm7 = vcmp.lt.s32.totalorder %v1470_v25, 113  ;;  %v650_v61 = vld [vmem:[#allocation2 + $0x28] sm:$0x77] }
  0x3b   : > { %v1418_v3 = vld [vmem:[%s392_s29] sm:$0xff]  ;;  %v485_v5 = vcombine.high %v1416_v2, %v1416_v2  ;;  %s1262_s29 = smov 127   ;;  %s1265_s25 = smov 111   ;;  %vm676_vm8 = vcmp.lt.s32.totalorder %v1470_v25, 112  ;;  %vm691_vm9 = vcmp.lt.s32.totalorder %v1470_v25, 111 }
  0x3c   : > { %v403_v4 = vcombine.high %v1418_v3, %v1418_v3  ;;  %v635_v57 = vld [vmem:[#allocation2 + $0x20] sm:$0x77]  ;;  %s1081_s18 = sshll.u32 %s1344_s17, 8  ;;  %p1566_p9 = scmp.ne.s32.totalorder %s1559_s23, 0 }
  0x3e   : > { %1059 = vmatprep.subr.msk.mxu0 %vm408_vm0, %v403_v4 }
  0x3f   : > { %1060 = vmatpush1.msk.msra.mxu0 %vm408_vm0, %v1418_v3 }
  0x40   : > { %1061 = vmatmul.mubr.msk.f32.vlgmr.msra.gmra.mrb[0].mxu0 %vm404_vm1, %v394_v7  ;;  %1062 = vmatprep.subr.msk.mxu0 %vm408_vm0, %v485_v5 }
  0x41   : > { %1063 = vmatpush1.msk.msra.mxu0 %vm408_vm0, %v1416_v2  ;;  %557 = vmatprep.mubr.f32.mxu0 %v1256_v0 }
  0x48   : > { %1064 = vmatmul.mubr.msk.f32.vlgmr.msra.gmra.mrb[0].mxu0 %vm404_vm1, %v393_v8  ;;  %v1266_v8 = vmov 839922192  }
  0xb6   : > { %v567_v9 = vpop.permute.xlu0 %566 }
 0x11b   : > { %v559_v10 = vpop.f32.mrb[0].mxu0 }
 0x11c   : > { %v569_v11 = vadd.f32 %v567_v9, %v559_v10  ;;  %v561_v12 = vpop.f32.mrb[1].mxu0  ;;  %v665_v10 = vld [vmem:[#allocation2 + $0x30] sm:$0x77] }
 0x11d   : > { %v570_v13 = vadd.f32 %v567_v9, %v561_v12  ;;  %v707_v9 = vunpack.c.l.s4 %v1266_v8 }
 0x11e   : > { %v1442_v14 = vmax.f32 %v569_v11, 0.0 }
 0x11f   : > { %v1444_v15 = vmax.f32 %v570_v13, 0.0 }
 0x120   : > { %589 = vrot.lane.b32.xlu1 %v1442_v14, %s1258_s11  ;;  %573 = vrot.lane.b32.xlu0 %v1442_v14, %s1259_s20 }
 0x121   : > { %v638_v16 = vcombine.low %v1442_v14, %v1444_v15 }
 0x123   : > { %v640_v60 = vmul.f32 %v638_v16, %v635_v57  ;;  %v708_v16 = vunpack.c.0.s8 %v707_v9 }
 0x124   : > { %604 = vrot.lane.b32.xlu1 %v1442_v14, %s1260_s21  ;;  %591 = vrot.lane.b32.xlu0 %v1444_v15, %s1258_s11 }
 0x128   : > { %619 = vrot.lane.b32.xlu1 %v1442_v14, %s1261_s26  ;;  %606 = vrot.lane.b32.xlu0 %v1444_v15, %s1260_s21 }
 0x12c   : > { %642 = vrot.lane.b32.xlu1 %v1442_v14, %s1262_s29  ;;  %621 = vrot.lane.b32.xlu0 %v1444_v15, %s1261_s26  ;;  %s1267_s26 = smov [#allocation5]  }
 0x130   : > { %644 = vrot.lane.b32.xlu0 %v1444_v15, %s1262_s29  ;;  %575 = vrot.lane.b32.xlu1 %v1444_v15, %s1259_s20  ;;  %s1503_s20 = scalar_lea.hbm %s1555_s10, %s1081_s18  ;;  %s1189_s29 = sshll.u32 %s1267_s26, 4  ;;  %s1190_s29 = int_to_ptr.vmem [resolvable:$false] %s1189_s29 }
 0x134   : > { %659 = vrot.lane.b32.xlu0 %v1444_v15, %s1263_s30  ;;  %657 = vrot.lane.b32.xlu1 %v1442_v14, %s1263_s30  ;;  %s380_s30 = sand.u32 1, %s1243_s14  }
 0x135   : > { %s951_s17 = scalar_lea.sflag [#allocation4], %s380_s30 }
 0x138   : > { %674 = vrot.lane.b32.xlu0 %v1444_v15, %s1264_s12  ;;  %672 = vrot.lane.b32.xlu1 %v1442_v14, %s1264_s12  ;;  %s1054_s12 = sshll.u32 %s380_s30, 4 }
 0x139   : > { %s382_s28 = scalar_lea.vmem [#allocation5], %s1054_s12  ;;  %s1191_s12 = scalar_lea.vmem %s1190_s29, 512 }
 0x13c   : > { %687 = vrot.lane.b32.xlu0 %v1442_v14, %s1265_s25  ;;  %704 = vperm.xlu1 %1150, %v396_v17  }
 0x140   : > { %943 = vperm.xlu0 %1149, %v399_v18   ;;  %689 = vrot.lane.b32.xlu1 %v1444_v15, %s1265_s25  ;;  %v710_v18 = vshrl.u32 %v577_v22, 7  ;;  %s965_s25 = sshll.u32 %s382_s28, 4  ;;  %s1505_s25 = int_to_ptr.vmem [resolvable:$true] %s965_s25 }
 0x141   : > { %s1185_s21 = scalar_lea.vmem %s1505_s25, 256  ;;  %p1192_p2 = scmp.lt.s32.totalorder %s1505_s25, %s1190_s29 }
 0x142   : > { %p1186_p6 = scmp.ne.s32.totalorder %s1505_s25, %s1185_s21  ;;  %p1193_p3 = scmp.lt.s32.totalorder %s1191_s12, %s1185_s21 }
 0x144   : > { %p1187_p10 = pnand %p1186_p6, %p1566_p9  ;;  %p1194_p4 = por %p1193_p3, %p1192_p2 }
 0x146   : > { %p1188_p12 = pneg %p1187_p10 }
 0x148   : > { %p1195_p7 = pnand %p1194_p4, %p1188_p12 }
 0x192   : > { %v590_v19 = vpop.permute.xlu1 %589  ;;  %v574_v20 = vpop.permute.xlu0 %573 }
 0x196   : > { %v605_v21 = vpop.permute.xlu1 %604  ;;  %v592_v23 = vpop.permute.xlu0 %591 }
 0x197   : > { %v594_v28 = vsel %vm593_vm2, %v590_v19, %v592_v23  ;;  %v595_v29 = vsel %vm593_vm2, %v592_v23, %v590_v19  ;;  %v680_v19 = vld [vmem:[#allocation2 + $0x38] sm:$0x77] }
 0x198   : > { %v600_v35 = vcombine.low %v595_v29, %v594_v28  ;;  %v711_v29 = vsub.s32 %v708_v16, %v710_v18 }
 0x19a   : > { %v620_v24 = vpop.permute.xlu1 %619  ;;  %v607_v27 = vpop.permute.xlu0 %606  ;;  %v602_v41 = vmul.f32 %v600_v35, %v597_v37 }
 0x19b   : > { %v609_v38 = vsel %vm608_vm4, %v605_v21, %v607_v27  ;;  %v610_v39 = vsel %vm608_vm4, %v607_v27, %v605_v21 }
 0x19c   : > { %v615_v42 = vcombine.low %v610_v39, %v609_v38 }
 0x19e   : > { %v643_v26 = vpop.permute.xlu1 %642  ;;  %v622_v36 = vpop.permute.xlu0 %621  ;;  %v617_v48 = vmul.f32 %v615_v42, %v612_v43  ;;  %v764_v42 = vsub.s32 5, %v710_v18 }
 0x19f   : > { %v624_v44 = vsel %vm623_vm5, %v620_v24, %v622_v36  ;;  %v625_v45 = vsel %vm623_vm5, %v622_v36, %v620_v24  ;;  %v695_v24 = vld [vmem:[#allocation2 + $0x40] sm:$0x77] }
 0x1a0   : > { %v630_v49 = vcombine.low %v625_v45, %v624_v44  ;;  %v736_v45 = vsub.s32 0, %v710_v18 }
 0x1a2   : > { %v576_v30 = vpop.permute.xlu1 %575  ;;  %v645_v46 = vpop.permute.xlu0 %644  ;;  %v632_v52 = vmul.f32 %v630_v49, %v627_v50 }
 0x1a3   : > { %v580_v31 = vsel %vm579_vm3, %v574_v20, %v576_v30  ;;  %v581_v32 = vsel %vm579_vm3, %v576_v30, %v574_v20  ;;  %v647_v55 = vsel %vm646_vm6, %v643_v26, %v645_v46  ;;  %v648_v56 = vsel %vm646_vm6, %v645_v46, %v643_v26 }
 0x1a4   : > { %v585_v34 = vcombine.low %v581_v32, %v580_v31  ;;  %v653_v59 = vcombine.low %v647_v55, %v648_v56  ;;  %v740_v46 = vsub.s32 4, %v710_v18 }
 0x1a6   : > { %v587_v40 = vmul.f32 %v585_v34, %v582_v33  ;;  %v660_v53 = vpop.permute.xlu0 %659  ;;  %v658_v54 = vpop.permute.xlu1 %657  ;;  %v655_v6 = vmul.f32 %v653_v59, %v650_v61 }
 0x1a7   : > { %v662_v62 = vsel %vm661_vm7, %v658_v54, %v660_v53  ;;  %v663_v63 = vsel %vm661_vm7, %v660_v53, %v658_v54 }
 0x1a8   : > { %v603_v47 = vadd.f32 %v602_v41, %v587_v40  ;;  %v668_v7 = vcombine.low %v662_v62, %v663_v63  ;;  %v760_v41 = vsub.s32 1, %v710_v18  ;;  %v398_v62 = vld [vmem:[%s1553_s8] sm:$0xff] }
 0x1aa   : > { %v618_v51 = vadd.f32 %v617_v48, %v603_v47  ;;  %v675_v4 = vpop.permute.xlu0 %674  ;;  %v673_v5 = vpop.permute.xlu1 %672  ;;  %v670_v14 = vmul.f32 %v668_v7, %v665_v10 }
 0x1ab   : > { %v677_v11 = vsel %vm676_vm8, %v673_v5, %v675_v4  ;;  %v678_v12 = vsel %vm676_vm8, %v675_v4, %v673_v5 }
 0x1ac   : > { %v633_v58 = vadd.f32 %v632_v52, %v618_v51  ;;  %v683_v15 = vcombine.low %v677_v11, %v678_v12 }
 0x1ae   : > { %v641_v1 = vadd.f32 %v640_v60, %v633_v58  ;;  %v688_v21 = vpop.permute.xlu0 %687  ;;  %v685_v28 = vmul.f32 %v683_v15, %v680_v19 }
 0x1b0   : > { %v656_v13 = vadd.f32 %v655_v6, %v641_v1 }
 0x1b2   : > { %v671_v20 = vadd.f32 %v670_v14, %v656_v13 }
 0x1b4   : > { %v686_v31 = vadd.f32 %v685_v28, %v671_v20 }
 0x1bb   : > { %v705_v17 = vpop.permute.xlu1 %704 }
 0x1bc   : > { %v712_v33 = vrot.slane %v705_v17, %v711_v29 }
 0x1bf   : > { %v690_v23 = vpop.permute.xlu1 %689 }
 0x1c0   : > { %v692_v26 = vsel %vm691_vm9, %v688_v21, %v690_v23  ;;  %v693_v27 = vsel %vm691_vm9, %v690_v23, %v688_v21 }
 0x1c1   : > { %v698_v30 = vcombine.low %v692_v26, %v693_v27 }
 0x1c3   : > { %v700_v32 = vmul.f32 %v698_v30, %v695_v24 }
 0x1c5   : > { %v701_v34 = vadd.f32 %v700_v32, %v686_v31 }
 0x1c7   : > { %v714_v22 = vadd.f32 %v712_v33, %v701_v34 }
 0x1c9   : > { %v715_v35 = vmax.f32 %v714_v22, 0.0 }
 0x1cb   : > { %v1065_v36 = vmul.f32 -1.442695, %v715_v35 }
 0x1cd   : > { %1153 = vpow2.f32 %v1065_v36 }
 0x1d7   : > { %v1154_v37 = vpop.eup %1153 }
 0x1d8   : > { %v719_v25 = vadd.f32 1.0, %v1154_v37 }
 0x1da   : > { %1155 = vrcp.f32 %v719_v25 }
 0x1e4   : > { %v1156_v38 = vpop.eup %1155 }
 0x1e5   : > { %v1067_v39 = vrot.slane %v1156_v38, 9  ;;  %v1066_v40 = vrot.slane %v1156_v38, 10 }
 0x1e7   : > { %v731_v43 = vmul.f32 %v1156_v38, %v1067_v39  ;;  %v726_v44 = vmul.f32 %v1156_v38, %v1066_v40 }
 0x1e9   : > { %v732_v47 = vadd.f32 1.0, %v731_v43  ;;  %v727_v48 = vadd.f32 1.0, %v726_v44 }
 0x1eb   : > { %v761_v49 = vrot.slane %v732_v47, %v760_v41  ;;  %v765_v50 = vrot.slane %v732_v47, %v764_v42  ;;  %v737_v51 = vrot.slane %v727_v48, %v736_v45  ;;  %v741_v52 = vrot.slane %v727_v48, %v740_v46 }
 0x1ed   : > { %v771_v53 = vrot.slane %v761_v49, %v760_v41  ;;  %v775_v54 = vrot.slane %v765_v50, %v760_v41  ;;  %v747_v55 = vrot.slane %v737_v51, %v736_v45  ;;  %v751_v56 = vrot.slane %v741_v52, %v736_v45 }
 0x1ef   : > { %v778_v57 = vcombine.low %v771_v53, %v775_v54  ;;  %v754_v58 = vcombine.low %v747_v55, %v751_v56 }
 0x1f1   : > { %v780_v59 = vmul.f32 %v778_v57, %v1418_v3  ;;  %v756_v60 = vmul.f32 %v754_v58, %v1416_v2  ;;  %v397_v2 = vld [vmem:[%s1552_s7] sm:$0xff]  ;;  %v944_v3 = vpop.permute.xlu0 %943 }
 0x1f3   : > { %v782_v61 = vcombine.high %v780_v59, %v780_v59  ;;  %v862_v63 = vcombine.high %v756_v60, %v756_v60 }
 0x1f5   : > { %1068 = vmatprep.subr.msk.mxu1 %vm408_vm0, %v782_v61 }
 0x1f6   : > { %1069 = vmatpush1.msk.msra.mxu1 %vm408_vm0, %v780_v59 }
 0x1f7   : > { %1070 = vmatmul.mubr.msk.f32.vlgmr.msra.gmra.mrb[0].mxu1 %vm404_vm1, %v398_v62  ;;  %1071 = vmatprep.subr.msk.mxu1 %vm408_vm0, %v862_v63 }
 0x1f8   : > { %1072 = vmatpush1.msk.msra.mxu1 %vm408_vm0, %v756_v60  ;;  %934 = vmatprep.mubr.f32.mxu1 %v1256_v0 }
 0x1ff   : > { %1073 = vmatmul.mubr.msk.f32.vlgmr.msra.gmra.mrb[0].mxu1 %vm404_vm1, %v397_v2 }
 0x2d2   : > { %v936_v1 = vpop.f32.mrb[0].mxu1 }
 0x2d3   : > { %v946_v4 = vadd.f32 %v944_v3, %v936_v1  ;;  %v938_v5 = vpop.f32.mrb[1].mxu1 }
 0x2d4   : > { %v947_v6 = vadd.f32 %v944_v3, %v938_v5 }
 0x2d5   : > { %948 = vst [vmem:[%s382_s28] sm:$0xff] %v946_v4 }
 0x2d6   : > { %949 = vst [vmem:[%s382_s28 + $0x8] sm:$0xff] %v947_v6 }
 0x2d7   : > { %1198 = shalt.err (!%p1195_p7)
}
 0x2d8   : > { %s1199_s30 = scalar_lea.hbm %s1503_s20, 256  ;;  %s1203_s27 = scalar_lea.hbm %s1555_s10, 512 }
 0x2d9   : > { %p1200_p8 = scmp.ne.s32.totalorder %s1503_s20, %s1199_s30  ;;  %p1204_p1 = scmp.lt.u32.totalorder %s1503_s20, %s1555_s10 }
 0x2da   : > { %p1205_p0 = scmp.lt.u32.totalorder %s1203_s27, %s1199_s30  ;;  %p1207_p6 = scmp.lt.u32.totalorder %s1199_s30, %s1503_s20 }
 0x2db   : > { %p1201_p11 = pnand %p1200_p8, %p1566_p9 }
 0x2dc   : > { %p1206_p5 = por %p1205_p0, %p1204_p1 }
 0x2dd   : > { %p1202_p13 = pneg %p1201_p11 }
 0x2de   : > { %p1208_p10 = por %p1207_p6, %p1206_p5 }
 0x2e0   : > { %p1209_p12 = pnand %p1208_p10, %p1202_p13 }
 0x2e2   : > { %1212 = shalt.err (!%p1209_p12)
}
 0x2e3   : > { %1090 = dma.vmem_to_hbm [thread:$0]  (%p1566_p9), %s1505_s25, 256, %s1503_s20, %s951_s17  }
 0x2e4 PF: > { %p1102_p2 = scmp.ge.s32.totalorder %s1251_s16, 2  ;;  %s977_s21 = sand.u32 1, %s1239_s13  }
 0x2e5   : > { %p1567_p3 = scmp.ne.s32.totalorder %s1560_s24, 0  ;;  %s978_s29 = scalar_lea.sflag [#allocation4], %s977_s21 }
 0x2e7   : > { %p1097_p4 = pnand %p1102_p2, %p1567_p3 }
 0x2e9   : > { %1234 = dma.done.wait (!%p1097_p4), %s978_s29, 256  }
 0x2ea   : > { %1236 = vsyncadd (!%p1097_p4), %s978_s29, 4294967040  ;;  %p21_p7 = scmp.ge.s32.totalorder %s1348_s19, 4   ;;  %s1568_s13 = smov %s1243_s14 }
 0x2eb   : > { %s1569_s14 = smov %s1247_s15  ;;  %s1570_s15 = smov %s1359_s22 }
 0x2ec   : > { %s1571_s16 = smov %s1348_s19  ;;  %23 = sbr.rel (!%p21_p7) target bundleno = 4 (0x4), region = 111 }
 0x2f3   :  { %983 = vsyncpa [#allocation3], 1 }
 0x2f4   :  { %985 = vsyncpa [#allocation3 + $0x1], 1 }
 0x2f5   :  { %986 = vsyncpa [#allocation4], 1 }
 0x2f6   :  { %988 = vsyncpa [#allocation4 + $0x1], 1 }

</bundles_post_ra>
